<compile_context>
chip_gen: v7x
topology: tpu7x:2x2x1
jax: 0.10.0
libtpu: 0.0.40
codegen_flags: <defaults>
</compile_context>

<pallas_src>
import jax
import jax.numpy as jnp
from jax.experimental import pallas as pl
from jax.experimental.pallas import tpu as pltpu

_LANES = 128      # vreg lane width (last dim)
_SUBLANES = 8     # vreg sublane granularity (second-to-last dim)


def mynet_kernel(s_ref, x_ref, o_ref):
    # s_ref: (2,) f32 in SMEM -> [a, c]; x_ref/o_ref: (block_rows, 128) f32 in VMEM.
    a = s_ref[0]
    c = s_ref[1]
    z = a * x_ref[...] + c                       # VPU (fused mul-add)
    # Exact sigmoid via a single EUP tanh: sigmoid(z) = 0.5*tanh(z/2) + 0.5.
    o_ref[...] = 0.5 * jnp.tanh(0.5 * z) + 0.5


def mynet_forward(x, w1, b1, w2, b2, *, block_rows=2048):
    """Forward pass of MyNet.

    x: (N, 1) f32.  Weights are stored as (in, out) (transposed vs. PyTorch),
    so semantically this computes  sigmoid((x @ w1 + b1) @ w2 + b2).
    """
    n = x.shape[0]

    # --- exact algebraic collapse of the two affine layers ------------------
    a = jnp.sum(w1[0, :] * w2[:, 0])                    # scalar slope
    c = (b1 @ w2 + b2)[0, 0]                            # scalar offset
    scalars = jnp.stack([a, c]).astype(jnp.float32)     # (2,) -> SMEM

    # --- tiling math ---------------------------------------------------------
    rows_needed = -(-n // _LANES)                                    # ceil(N/128)
    rows_needed = max(_SUBLANES, -(-rows_needed // _SUBLANES) * _SUBLANES)

    # enforce multiple-of-8 block rows (the (8,128) block-shape rule)
    block_rows = max(_SUBLANES, (block_rows // _SUBLANES) * _SUBLANES)
    block_rows = min(block_rows, rows_needed)
    # ensure >=2 grid steps when there is enough work (v7x has 2 TCs to shard over)
    if rows_needed >= 2 * _SUBLANES and block_rows > rows_needed // 2:
        block_rows = max(_SUBLANES, ((rows_needed // 2) // _SUBLANES) * _SUBLANES)

    rows_pad = -(-rows_needed // block_rows) * block_rows
    n_pad = rows_pad * _LANES

    # --- lane-dense layout: (N, 1) -> (rows_pad, 128) ------------------------
    x_flat = jnp.reshape(x.astype(jnp.float32), (-1,))
    if n_pad != n:                       # fast path: no extra HBM pass when full
        x_flat = jnp.pad(x_flat, (0, n_pad - n))
    x2d = x_flat.reshape(rows_pad, _LANES)

    out2d = pl.pallas_call(
        mynet_kernel,
        out_shape=jax.ShapeDtypeStruct((rows_pad, _LANES), jnp.float32),
        grid=(rows_pad // block_rows,),
        in_specs=[
            # two scalars, whole array resident in SMEM (no DMA per step)
            pl.BlockSpec(memory_space=pltpu.MemorySpace.SMEM),
            # lane-dense row tiles of x
            pl.BlockSpec((block_rows, _LANES), lambda i: (i, 0)),
        ],
        out_specs=pl.BlockSpec((block_rows, _LANES), lambda i: (i, 0)),
        compiler_params=pltpu.CompilerParams(
            dimension_semantics=("parallel",)),   # shards rows across TCs on v7x
    )(scalars, x2d)

    # undo padding / repacking (no-op slice when n == n_pad)
    out_flat = out2d.reshape(-1)
    if n_pad != n:
        out_flat = out_flat[:n]
    return out_flat.reshape(n, 1)


def init_params(key):
    """Deterministic init mimicking torch.nn.Linear (uniform(-1/sqrt(fan_in), +))."""
    k1, k2, k3, k4 = jax.random.split(key, 4)
    bound1 = 1.0                                  # Linear(1, 50): fan_in = 1
    w1 = jax.random.uniform(k1, (1, 50), jnp.float32, -bound1, bound1)  # (in, out)
    b1 = jax.random.uniform(k2, (1, 50), jnp.float32, -bound1, bound1)
    bound2 = 1.0 / jnp.sqrt(50.0)                 # Linear(50, 1): fan_in = 50
    w2 = jax.random.uniform(k3, (50, 1), jnp.float32, -bound2, bound2)  # (in, out)
    b2 = jax.random.uniform(k4, (1, 1), jnp.float32, -bound2, bound2)
    return w1, b1, w2, b2


if __name__ == "__main__":
    key = jax.random.PRNGKey(0)
    kx, kp = jax.random.split(key)
    w1, b1, w2, b2 = init_params(kp)

    def ref_fn(xv):  # pure-JAX reference of the original module
        return jax.nn.sigmoid((xv @ w1 + b1) @ w2 + b2)

    # Small demo shape consistent with the module: batch of scalar features.
    N = 8
    x = jax.random.normal(kx, (N, 1), jnp.float32)
    out = jax.block_until_ready(mynet_forward(x, w1, b1, w2, b2))
    assert out.shape == (N, 1)
    assert jnp.allclose(out, ref_fn(x), atol=1e-4, rtol=1e-4)

    # Second run exercising the multi-step row grid and the ragged-tail path.
    N2 = 3000
    x2 = jax.random.normal(kx, (N2, 1), jnp.float32)
    out2 = jax.block_until_ready(mynet_forward(x2, w1, b1, w2, b2, block_rows=8))
    assert out2.shape == (N2, 1)
    assert jnp.allclose(out2, ref_fn(x2), atol=1e-4, rtol=1e-4)

    # Third run: default (large) block_rows on a multi-block input.
    N3 = 4096 * 2
    x3 = jax.random.normal(kx, (N3, 1), jnp.float32)
    out3 = jax.block_until_ready(mynet_forward(x3, w1, b1, w2, b2))
    assert out3.shape == (N3, 1)
    assert jnp.allclose(out3, ref_fn(x3), atol=1e-4, rtol=1e-4)

    print("KERNEL_OK")
</pallas_src>

<mosaic_0001>
module attributes {stable_mosaic.version = 11 : i64} {
  func.func @mynet_kernel(%arg0: i32, %arg1: memref<2xf32, #tpu.memory_space<smem>>, %arg2: memref<8x128xf32, #tpu.memory_space<vmem>>, %arg3: memref<8x128xf32, #tpu.memory_space<vmem>>) attributes {dimension_semantics = [#tpu.dimension_semantics<parallel>], iteration_bounds = array<i64: 1>, scalar_prefetch = 0 : i64, scratch_operands = 0 : i64, tpu.core_type = #tpu.core_type<tc>, window_params = [{transform_indices = @transform_0, window_bounds = array<i64: 2>}, {transform_indices = @transform_1, window_bounds = array<i64: 8, 128>}, {transform_indices = @transform_2, window_bounds = array<i64: 8, 128>}]} {
    %c0 = arith.constant 0 : index
    %0 = memref.load %arg1[%c0] : memref<2xf32, #tpu.memory_space<smem>>
    %c1 = arith.constant 1 : index
    %1 = memref.load %arg1[%c1] : memref<2xf32, #tpu.memory_space<smem>>
    %c0_0 = arith.constant 0 : index
    %c0_1 = arith.constant 0 : index
    %2 = vector.load %arg2[%c0_0, %c0_1] : memref<8x128xf32, #tpu.memory_space<vmem>>, vector<8x128xf32>
    %3 = vector.broadcast %0 : f32 to vector<8x128xf32>
    %4 = arith.mulf %3, %2 : vector<8x128xf32>
    %5 = vector.broadcast %1 : f32 to vector<8x128xf32>
    %6 = arith.addf %4, %5 : vector<8x128xf32>
    %cst = arith.constant 5.000000e-01 : f32
    %7 = vector.broadcast %cst : f32 to vector<8x128xf32>
    %8 = arith.mulf %7, %6 : vector<8x128xf32>
    %9 = math.tanh %8 : vector<8x128xf32>
    %cst_2 = arith.constant 5.000000e-01 : f32
    %10 = vector.broadcast %cst_2 : f32 to vector<8x128xf32>
    %11 = arith.mulf %10, %9 : vector<8x128xf32>
    %cst_3 = arith.constant 5.000000e-01 : f32
    %12 = vector.broadcast %cst_3 : f32 to vector<8x128xf32>
    %13 = arith.addf %11, %12 : vector<8x128xf32>
    %c0_4 = arith.constant 0 : index
    %c0_5 = arith.constant 0 : index
    %14 = vector.load %arg3[%c0_4, %c0_5] : memref<8x128xf32, #tpu.memory_space<vmem>>, vector<8x128xf32>
    tpu.vector_store %arg3[%c0_4, %c0_5], %13 {strides = array<i32>} : memref<8x128xf32, #tpu.memory_space<vmem>>, vector<8x128xf32>,
    return
  }
  func.func @transform_0(%arg0: i32) -> i32 {
    %c0_i32 = arith.constant 0 : i32
    %c0_i32_0 = arith.constant 0 : i32
    return %c0_i32 : i32
  }
  func.func @transform_1(%arg0: i32) -> (i32, i32) {
    %c0_i32 = arith.constant 0 : i32
    %c0_i32_0 = arith.constant 0 : i32
    return %arg0, %c0_i32 : i32, i32
  }
  func.func @transform_2(%arg0: i32) -> (i32, i32) {
    %c0_i32 = arith.constant 0 : i32
    %c0_i32_0 = arith.constant 0 : i32
    return %arg0, %c0_i32 : i32, i32
  }
}

</mosaic_0001>

<bundles_post_ra>
// kernel: tpu_custom_call.1
= control target key start
LH: loop header
LB: loop body
LE: loop exit
PB: predicated region body
PF: predicated region fallthrough
CT: control target
= control target key end

     0   :  { %7 = vsyncpa [#allocation5], 0  ;;  %s183_s0 = inlined_call_operand.hbm [shape: f32[2], index: 0, kind: input, shape index: {}]   ;;  %s184_s1 = inlined_call_operand.hbm [shape: f32[8,128], index: 1, kind: input, shape index: {}]   ;;  %s185_s2 = inlined_call_operand.hbm [shape: f32[8,128], index: 2, kind: output, shape index: {}]  }
   0x1   :  { %8 = vsyncpa [#allocation3], 0 }
   0x2   :  { %9 = vsyncpa [#allocation4], 0  ;;  %s69_s11 = scalar_lea.hbm %s183_s0, 16 }
   0x3   :  { %p70_p0 = scmp.ne.s32.totalorder %s183_s0, %s69_s11  ;;  %p73_p1 = scmp.lt.u32.totalorder %s69_s11, %s183_s0 }
   0x5   :  { %p75_p2 = pnand %p73_p1, %p70_p0 }
   0x7   :  { %78 = shalt.err (!%p75_p2)
}
   0x8   :  { %s129_s16 = smov [#allocation2]   ;;  %s130_s19 = smov [#allocation6]  }
   0x9   :  { %17 = dma.hbm_to_smem %s183_s0, 16, %s129_s16, [#allocation5]  }
   0xa   :  { %s24_s20 = sshll.u32 %s130_s19, 4  ;;  %s79_s23 = scalar_lea.hbm %s184_s1, 128  ;;  %s25_s20 = int_to_ptr.vmem [resolvable:$true] %s24_s20 }
   0xb   :  { %p80_p3 = scmp.ne.s32.totalorder %s184_s1, %s79_s23  ;;  %p83_p4 = scmp.lt.u32.totalorder %s79_s23, %s184_s1 }
   0xd   :  { %p85_p5 = pnand %p83_p4, %p80_p3 }
   0xf   :  { %88 = shalt.err (!%p85_p5)
}
  0x10   :  { %s89_s28 = scalar_lea.vmem %s25_s20, 128  ;;  %p94_p7 = scmp.lt.s32.totalorder %s25_s20, %s25_s20 }
  0x11   :  { %p90_p6 = scmp.ne.s32.totalorder %s25_s20, %s89_s28  ;;  %p95_p8 = scmp.lt.s32.totalorder %s89_s28, %s89_s28 }
  0x13   :  { %p96_p9 = por %p95_p8, %p94_p7 }
  0x15   :  { %p97_p10 = pnand %p96_p9, %p90_p6 }
  0x17   :  { %100 = shalt.err (!%p97_p10)
}
  0x18   :  { %27 = dma.hbm_to_vmem [thread:$0]  %s184_s1, 128, %s25_s20, [#allocation3]  }
  0x19   :  { %123 = dma.done.wait [#allocation5], 16  }
  0x1a   :  { %124 = vsyncadd [#allocation5], 4294967280 }
  0x1b   :  { %125 = dma.done.wait [#allocation3], 128  }
  0x1c   :  { %126 = vsyncadd [#allocation3], 4294967168 }
  0x1d   :  { %34 = sfence }
  0x1e   :  { %s35_s30 = sld [smem:[#allocation2]]  ;;  %s63_s3 = sld [smem:[#allocation2 + $0x1]]  ;;  %v37_v0 = vld [vmem:[#allocation6] sm:$0xff] }
  0x1f   :  { %s131_s4 = smov [#allocation7]  }
  0x20   :  { %s53_s5 = sshll.u32 %s131_s4, 4  ;;  %s54_s5 = int_to_ptr.vmem [resolvable:$true] %s53_s5 }
  0x21   :  { %s101_s1 = scalar_lea.vmem %s54_s5, 128  ;;  %p106_p12 = scmp.lt.s32.totalorder %s54_s5, %s54_s5 }
  0x22   :  { %p102_p11 = scmp.ne.s32.totalorder %s54_s5, %s101_s1  ;;  %p107_p13 = scmp.lt.s32.totalorder %s101_s1, %s101_s1 }
  0x24   :  { %v38_v1 = vstv %s35_s30  ;;  %v40_v2 = vstv %s63_s3  ;;  %p108_p0 = por %p107_p13, %p106_p12 }
  0x25   :  { %v39_v3 = vmul.f32 %v38_v1, %v37_v0 }
  0x26   :  { %p109_p1 = pnand %p108_p0, %p102_p11 }
  0x27   :  { %v41_v4 = vadd.f32 %v40_v2, %v39_v3 }
  0x29   :  { %v42_v5 = vmul.f32 0.5, %v41_v4 }
  0x2b   :  { %67 = vtanh.f32 %v42_v5 }
  0x35   :  { %v68_v6 = vpop.eup %67 }
  0x36   :  { %v44_v7 = vmul.f32 0.5, %v68_v6 }
  0x38   :  { %v45_v8 = vadd.f32 0.5, %v44_v7 }
  0x3a   :  { %46 = vst [vmem:[#allocation7] sm:$0xff] %v45_v8 }
  0x3b   :  { %112 = shalt.err (!%p109_p1)
}
  0x3c   :  { %s113_s8 = scalar_lea.hbm %s185_s2, 128 }
  0x3d   :  { %p114_p2 = scmp.ne.s32.totalorder %s185_s2, %s113_s8  ;;  %p117_p3 = scmp.lt.u32.totalorder %s113_s8, %s185_s2 }
  0x3f   :  { %p119_p4 = pnand %p117_p3, %p114_p2 }
  0x41   :  { %122 = shalt.err (!%p119_p4)
}
  0x42   :  { %56 = dma.vmem_to_hbm [thread:$0]  %s54_s5, 128, %s185_s2, [#allocation4]  }
  0x43   :  { %127 = dma.done.wait [#allocation4], 128  }
  0x44   :  { %128 = vsyncadd [#allocation4], 4294967168 }
  0x45   :  { %60 = vsyncpa [#allocation3], 1 }
  0x46   :  { %61 = vsyncpa [#allocation4], 1 }
  0x47   :  { %62 = vsyncpa [#allocation5], 1 }

</bundles_post_ra>
